<compile_context>
chip_gen: v7x
topology: tpu7x:2x2x1
jax: 0.10.0
libtpu: 0.0.40
codegen_flags: <defaults>
</compile_context>

<pallas_src>
import math

import jax
import jax.numpy as jnp
from jax.experimental import pallas as pl
from jax.experimental.pallas import tpu as pltpu


def _patch_embed_kernel(p_ref, w_ref, b_ref, o_ref):
    # p_ref: (TILE_MG, Kg)  grouped flattened patches (lane-dense)
    # w_ref: (Kg, Ng)       block-diagonal projection weight (VMEM resident)
    # b_ref: (1, Ng)        tiled bias, f32 (VMEM resident)
    # o_ref: (TILE_MG, Ng)  grouped output (full-lane, unmasked stores)
    acc = jnp.dot(p_ref[...], w_ref[...], preferred_element_type=jnp.float32)
    o_ref[...] = (acc + b_ref[...]).astype(o_ref.dtype)


def _round_up(x, m):
    return -(-x // m) * m


def _choose_tile_mg(Mg, Kg, Ng, in_bytes, out_bytes, budget_bytes):
    """Pick the grouped-row tile: big enough that the per-step DMA hides the
    ~0.35us grid-step overhead, inside the VMEM budget (double-buffered in/out
    plus resident weight), and leaving >= 2 grid steps so v7x's two
    TensorCores both get work."""
    if Mg <= 8:
        return Mg                                  # single full-size block
    w_bytes = Kg * Ng * in_bytes                   # resident weight
    per_row = 2 * (Kg * in_bytes + Ng * out_bytes)  # double-buffered in + out
    avail = max(budget_bytes - 2 * w_bytes, 8 * per_row)
    tile = min(avail // per_row, 4096)
    half = _round_up(-(-Mg // 2), 8)               # guarantee >= 2 grid steps
    tile = min(tile, max(8, half))
    return int(max(8, (tile // 8) * 8))


def make_patch_embed(weight, bias, kernel_size=(4, 4), stride=(4, 4), *,
                     compute_dtype=None, out_dtype=None,
                     vmem_budget_bytes=24 << 20):
    """Returns apply(x): (B, C, H, W) NCHW -> (B, H//kh, W//kw, embed_dim) NHWC.

    Equivalent to nn.Conv2d(C, embed_dim, kernel_size, stride, padding=0)
    followed by .permute(0, 2, 3, 1).  Weight/bias preprocessing is hoisted
    here and done once per module, not per forward call.
    """
    assert tuple(kernel_size) == tuple(stride), \
        "PatchEmbed kernel assumes kernel_size == stride (non-overlapping patches)"
    kh, kw = kernel_size
    N, C = weight.shape[0], weight.shape[1]
    K = C * kh * kw

    # Group g patches per kernel row so the output lane dim is a full multiple
    # of 128 (unmasked stores); otherwise pad embed_dim up to a 128 multiple.
    if N < 128 and 128 % N == 0:
        g, N_eff = 128 // N, N
    else:
        g, N_eff = 1, _round_up(N, 128)
    Kg, Ng = g * K, g * N_eff

    # ---- one-time weight / bias preprocessing (off the per-forward path) ----
    w2d = weight.reshape(N, K).T                      # (K, N), rows = (c,i,j)
    b1 = bias
    if N_eff != N:
        w2d = jnp.pad(w2d, ((0, 0), (0, N_eff - N)))  # zero cols, sliced later
        b1 = jnp.pad(bias, (0, N_eff - N))
    if g > 1:
        w_blk = jnp.kron(jnp.eye(g, dtype=w2d.dtype), w2d)  # rows = (p,c,i,j)
        # Reorder rows to (c, i, p, j): matching the patch layout below keeps
        # g*kw contiguous input elements per gathered HBM segment (DMA-friendly
        # fused transpose) instead of kw-element (16 B) runs.
        w_blk = (w_blk.reshape(g, C, kh, kw, Ng)
                      .transpose(1, 2, 0, 3, 4)
                      .reshape(Kg, Ng))
        b_g = jnp.tile(b1.astype(jnp.float32), g).reshape(1, Ng)
    else:
        w_blk = w2d
        b_g = b1.astype(jnp.float32).reshape(1, Ng)
    if compute_dtype is not None:
        w_blk = w_blk.astype(compute_dtype)

    def apply(x):
        B, Cx, H, W = x.shape
        assert Cx == C, "channel mismatch"
        assert H % kh == 0 and W % kw == 0, "spatial dims must be patch-aligned"
        Hp, Wp = H // kh, W // kw
        M = B * Hp * Wp

        cdt = compute_dtype if compute_dtype is not None else x.dtype
        odt = out_dtype if out_dtype is not None else x.dtype
        in_bytes = jnp.dtype(cdt).itemsize
        out_bytes = jnp.dtype(odt).itemsize
        w_in = w_blk if w_blk.dtype == cdt else w_blk.astype(cdt)

        Mg = -(-M // g)
        tile_mg = _choose_tile_mg(Mg, Kg, Ng, in_bytes, out_bytes,
                                  vmem_budget_bytes)
        Mg_pad = _round_up(Mg, tile_mg)

        # ---- patch extraction glue (fused into the pallas_call input DMA).
        # Grouped-K layout per kernel row is (c, i, p, j): p = patch index
        # within the group, j = kw index, so consecutive (p, j) read contiguous
        # W-axis bytes from the NCHW input whenever a group stays on one patch
        # row.
        if g > 1 and Wp % g == 0:
            # direct path: each group of g patches shares (b, hp)
            pg = (x.reshape(B, C, Hp, kh, Wp // g, g, kw)
                   .transpose(0, 2, 4, 1, 3, 5, 6))   # (B,Hp,Wp//g,C,kh,g,kw)
            patches_g = pg.reshape(Mg, Kg)
            if Mg_pad != Mg:
                patches_g = jnp.pad(patches_g, ((0, Mg_pad - Mg), (0, 0)))
        else:
            patches = (x.reshape(B, C, Hp, kh, Wp, kw)
                        .transpose(0, 2, 4, 1, 3, 5)   # (B,Hp,Wp,C,kh,kw)
                        .reshape(M, K))
            M_pad = Mg_pad * g
            if M_pad != M:
                patches = jnp.pad(patches, ((0, M_pad - M), (0, 0)))
            patches_g = (patches.reshape(Mg_pad, g, C, kh, kw)
                                .transpose(0, 2, 3, 1, 4)   # (.., C, kh, g, kw)
                                .reshape(Mg_pad, Kg))
        patches_g = patches_g.astype(cdt)

        # VMEM accounting: double-buffered in/out tiles + resident weight/bias.
        need = (2 * tile_mg * (Kg * in_bytes + Ng * out_bytes)
                + 2 * Kg * Ng * in_bytes + 2 * Ng * 4)
        vmem_limit = int(min(max(need + (8 << 20), 32 << 20), 56 << 20))

        grid = (Mg_pad // tile_mg,)
        out_g = pl.pallas_call(
            _patch_embed_kernel,
            out_shape=jax.ShapeDtypeStruct((Mg_pad, Ng), odt),
            grid=grid,
            in_specs=[
                pl.BlockSpec((tile_mg, Kg), lambda i: (i, 0)),  # streamed rows
                pl.BlockSpec((Kg, Ng), lambda i: (0, 0)),       # resident weight
                pl.BlockSpec((1, Ng), lambda i: (0, 0)),        # resident bias
            ],
            out_specs=pl.BlockSpec((tile_mg, Ng), lambda i: (i, 0)),
            compiler_params=pltpu.CompilerParams(
                dimension_semantics=("parallel",),    # rows fully independent
                vmem_limit_bytes=vmem_limit,
                allow_input_fusion=[True, False, False],  # fuse patch transpose
            ),
        )(patches_g, w_in, b_g)

        out_flat = out_g.reshape(Mg_pad * g, N_eff)[:M, :N]
        return out_flat.reshape(B, Hp, Wp, N)

    return apply


def patch_embed(x, weight, bias, kernel_size=(4, 4), stride=(4, 4), **kwargs):
    """One-shot convenience wrapper (prefer make_patch_embed under jit)."""
    return make_patch_embed(weight, bias, kernel_size, stride, **kwargs)(x)


if __name__ == "__main__":
    # Module defaults: kernel_size=(4,4), stride=(4,4), padding=(0,0),
    # in_chans=1, embed_dim=16.
    in_chans, embed_dim = 1, 16
    kh, kw = 4, 4
    B, H, W = 2, 16, 16

    key = jax.random.PRNGKey(0)
    kx, kw_key, kb_key = jax.random.split(key, 3)

    x = jax.random.normal(kx, (B, in_chans, H, W), dtype=jnp.float32)

    # Deterministic Conv2d-style init (kaiming-uniform-ish bounds).
    fan_in = in_chans * kh * kw
    bound = 1.0 / math.sqrt(fan_in)
    weight = jax.random.uniform(
        kw_key, (embed_dim, in_chans, kh, kw),
        minval=-bound, maxval=bound, dtype=jnp.float32)
    bias = jax.random.uniform(
        kb_key, (embed_dim,), minval=-bound, maxval=bound, dtype=jnp.float32)

    # Reference: XLA conv + NCHW->NHWC permute + bias (PyTorch forward).
    ref = jax.lax.conv_general_dilated(
        x, weight, window_strides=(kh, kw), padding="VALID",
        dimension_numbers=("NCHW", "OIHW", "NCHW"))
    ref = jnp.transpose(ref, (0, 2, 3, 1)) + bias

    # f32 path (tight tolerance).
    embed_f32 = make_patch_embed(weight, bias, (kh, kw), (kh, kw))
    out = jax.block_until_ready(jax.jit(embed_f32)(x))
    assert out.shape == (B, H // kh, W // kw, embed_dim)
    err = float(jnp.max(jnp.abs(out - ref)))
    assert jnp.allclose(out, ref, atol=1e-5, rtol=1e-5), f"f32 max abs err = {err:e}"

    # bf16 streamed path (memory-bound win); f32 accumulate/output, looser tol.
    embed_bf16 = make_patch_embed(weight, bias, (kh, kw), (kh, kw),
                                  compute_dtype=jnp.bfloat16,
                                  out_dtype=jnp.float32)
    out_bf16 = jax.block_until_ready(jax.jit(embed_bf16)(x))
    err16 = float(jnp.max(jnp.abs(out_bf16 - ref)))
    assert jnp.allclose(out_bf16, ref, atol=5e-2, rtol=5e-2), \
        f"bf16 max abs err = {err16:e}"

    print("KERNEL_OK")
</pallas_src>

<mosaic_0001>
module attributes {stable_mosaic.version = 11 : i64} {
  func.func @_patch_embed_kernel(%arg0: i32, %arg1: memref<4x128xf32, #tpu.memory_space<vmem>>, %arg2: memref<128x128xf32, #tpu.memory_space<vmem>>, %arg3: memref<1x128xf32, #tpu.memory_space<vmem>>, %arg4: memref<4x128xf32, #tpu.memory_space<vmem>>) attributes {dimension_semantics = [#tpu.dimension_semantics<parallel>], iteration_bounds = array<i64: 1>, scalar_prefetch = 0 : i64, scratch_operands = 0 : i64, tpu.core_type = #tpu.core_type<tc>, window_params = [{transform_indices = @transform_0, window_bounds = array<i64: 4, 128>}, {pipeline_mode = #tpu.pipeline_mode<synchronous>, transform_indices = @transform_1, window_bounds = array<i64: 128, 128>}, {pipeline_mode = #tpu.pipeline_mode<synchronous>, transform_indices = @transform_2, window_bounds = array<i64: 1, 128>}, {transform_indices = @transform_3, window_bounds = array<i64: 4, 128>}]} {
    %c0 = arith.constant 0 : index
    %c0_0 = arith.constant 0 : index
    %0 = vector.load %arg1[%c0, %c0_0] : memref<4x128xf32, #tpu.memory_space<vmem>>, vector<4x128xf32>
    %c0_1 = arith.constant 0 : index
    %c0_2 = arith.constant 0 : index
    %1 = vector.load %arg2[%c0_1, %c0_2] : memref<128x128xf32, #tpu.memory_space<vmem>>, vector<128x128xf32>
    %cst = arith.constant dense<0.000000e+00> : vector<4x128xf32>
    %2 = tpu.matmul %0, %1, %cst {dimension_numbers = #tpu.dot_dimension_numbers<[1], [0], [0], [1], [0, 0, 1, 1], [], []>} : vector<4x128xf32>, vector<128x128xf32>, vector<4x128xf32> -> vector<4x128xf32>
    %c0_3 = arith.constant 0 : index
    %c0_4 = arith.constant 0 : index
    %3 = vector.load %arg3[%c0_3, %c0_4] : memref<1x128xf32, #tpu.memory_space<vmem>>, vector<1x128xf32>
    %4 = vector.broadcast %3 : vector<1x128xf32> to vector<4x128xf32>
    %5 = arith.addf %2, %4 : vector<4x128xf32>
    %c0_5 = arith.constant 0 : index
    %c0_6 = arith.constant 0 : index
    %6 = vector.load %arg4[%c0_5, %c0_6] : memref<4x128xf32, #tpu.memory_space<vmem>>, vector<4x128xf32>
    tpu.vector_store %arg4[%c0_5, %c0_6], %5 {strides = array<i32>} : memref<4x128xf32, #tpu.memory_space<vmem>>, vector<4x128xf32>,
    return
  }
  func.func @transform_0(%arg0: i32) -> (i32, i32) {
    %c0_i32 = arith.constant 0 : i32
    %c0_i32_0 = arith.constant 0 : i32
    return %arg0, %c0_i32 : i32, i32
  }
  func.func @transform_1(%arg0: i32) -> (i32, i32) {
    %c0_i32 = arith.constant 0 : i32
    %c0_i32_0 = arith.constant 0 : i32
    %c0_i32_1 = arith.constant 0 : i32
    return %c0_i32, %c0_i32_0 : i32, i32
  }
  func.func @transform_2(%arg0: i32) -> (i32, i32) {
    %c0_i32 = arith.constant 0 : i32
    %c0_i32_0 = arith.constant 0 : i32
    %c0_i32_1 = arith.constant 0 : i32
    return %c0_i32, %c0_i32_0 : i32, i32
  }
  func.func @transform_3(%arg0: i32) -> (i32, i32) {
    %c0_i32 = arith.constant 0 : i32
    %c0_i32_0 = arith.constant 0 : i32
    return %arg0, %c0_i32 : i32, i32
  }
}

</mosaic_0001>

<bundles_post_ra>
// kernel: apply.1
= control target key start
LH: loop header
LB: loop body
LE: loop exit
PB: predicated region body
PF: predicated region fallthrough
CT: control target
= control target key end

     0   :  { %v193_v0 = vmov 0.0|0.0   ;;  %vm194_vm0 = vmmov 0   ;;  %v195_v4 = vmov 0.0   ;;  %s273_s1 = inlined_call_operand.vmem [shape: f32[128,128], index: 1, kind: input, shape index: {}]   ;;  %s274_s0 = inlined_call_operand.vmem [shape: f32[4,128], index: 0, kind: input, shape index: {}]   ;;  %s275_s2 = inlined_call_operand.vmem [shape: f32[1,128], index: 2, kind: input, shape index: {}]   ;;  %s276_s3 = inlined_call_operand.vmem [shape: f32[4,128], index: 3, kind: output, shape index: {}]  }
   0x1   :  { %166 = vmatprep.subr.bf16.mxu0 %v193_v0  ;;  %v15_v1 = vld [vmem:[%s273_s1] sm:$0xff]  ;;  %v16_v2 = vld [vmem:[%s273_s1 + $0x8] sm:$0xff]  ;;  %v17_v3 = vld [vmem:[%s273_s1 + $0x10] sm:$0xff]  ;;  %163 = vmatprep.mubr.msk.f32.mxu0 %vm194_vm0, %v195_v4 }
   0x2   :  { %v167_v5 = vpack.c.bf16 %v16_v2, %v15_v1  ;;  %v18_v6 = vld [vmem:[%s273_s1 + $0x18] sm:$0xff]  ;;  %v19_v8 = vld [vmem:[%s273_s1 + $0x20] sm:$0xff]  ;;  %v20_v9 = vld [vmem:[%s273_s1 + $0x28] sm:$0xff] }
   0x3   :  { %v170_v7 = vpack.c.bf16 %v18_v6, %v17_v3  ;;  %v173_v10 = vpack.c.bf16 %v20_v9, %v19_v8  ;;  %v21_v11 = vld [vmem:[%s273_s1 + $0x30] sm:$0xff]  ;;  %v22_v12 = vld [vmem:[%s273_s1 + $0x38] sm:$0xff]  ;;  %v23_v14 = vld [vmem:[%s273_s1 + $0x40] sm:$0xff] }
   0x4   :  { %168 = vmatpush3.bf16.msra.mxu0 %v167_v5  ;;  %v176_v13 = vpack.c.bf16 %v22_v12, %v21_v11  ;;  %v24_v15 = vld [vmem:[%s273_s1 + $0x48] sm:$0xff]  ;;  %v25_v17 = vld [vmem:[%s273_s1 + $0x50] sm:$0xff]  ;;  %v26_v18 = vld [vmem:[%s273_s1 + $0x58] sm:$0xff] }
   0x5   :  { %169 = vmatprep.subr.bf16.mxu0 %v193_v0  ;;  %v179_v16 = vpack.c.bf16 %v24_v15, %v23_v14  ;;  %v182_v19 = vpack.c.bf16 %v26_v18, %v25_v17  ;;  %v27_v20 = vld [vmem:[%s273_s1 + $0x60] sm:$0xff]  ;;  %v28_v21 = vld [vmem:[%s273_s1 + $0x68] sm:$0xff]  ;;  %v29_v23 = vld [vmem:[%s273_s1 + $0x70] sm:$0xff] }
   0x6   :  { %v185_v22 = vpack.c.bf16 %v28_v21, %v27_v20  ;;  %v30_v24 = vld [vmem:[%s273_s1 + $0x78] sm:$0xff]  ;;  %v14_v26 = vld [vmem:[%s274_s0] sm:$0xf] }
   0x7   :  { %v188_v25 = vpack.c.bf16 %v30_v24, %v29_v23  ;;  %v113_v27 = vld [vmem:[%s275_s2] ss:$0 sm:$0xff] }
   0x8   :  { %171 = vmatpush3.bf16.msra.mxu0 %v170_v7 }
   0x9   :  { %172 = vmatprep.subr.bf16.mxu0 %v193_v0 }
   0xc   :  { %174 = vmatpush3.bf16.msra.mxu0 %v173_v10 }
   0xd   :  { %175 = vmatprep.subr.bf16.mxu0 %v193_v0 }
  0x10   :  { %177 = vmatpush3.bf16.msra.mxu0 %v176_v13 }
  0x11   :  { %178 = vmatprep.subr.bf16.mxu0 %v193_v0 }
  0x14   :  { %180 = vmatpush3.bf16.msra.mxu0 %v179_v16 }
  0x15   :  { %181 = vmatprep.subr.bf16.mxu0 %v193_v0 }
  0x18   :  { %183 = vmatpush3.bf16.msra.mxu0 %v182_v19 }
  0x19   :  { %184 = vmatprep.subr.bf16.mxu0 %v193_v0 }
  0x1c   :  { %186 = vmatpush3.bf16.msra.mxu0 %v185_v22 }
  0x1d   :  { %187 = vmatprep.subr.bf16.mxu0 %v193_v0 }
  0x20   :  { %189 = vmatpush3.bf16.msra.mxu0 %v188_v25 }
  0x23   :  { %164 = vmatmul.mubr.f32.vlgmr.msra.gmra.mrb[0].mxu0 %v14_v26 }
  0xf6   :  { %v104_v28 = vpop.f32.mrb[0].mxu0 }
  0xf7   :  { %v105_v29 = vadd.f32 %v113_v27, %v104_v28  ;;  %v165_v30 = vpop.f32.mrb[1].mxu0 }
  0xf9   :  { %108 = vst [vmem:[%s276_s3] sm:$0xf] %v105_v29 }

</bundles_post_ra>
